<compile_context>
chip_gen: v5e
topology: v5e:2x2
jax: 0.10.0
libtpu: 0.0.40
codegen_flags: <defaults>
</compile_context>

<pallas_src>
import jax
import jax.numpy as jnp
from jax import lax
from jax.experimental import pallas as pl
from jax.experimental.pallas import tpu as pltpu


_EPS = 1e-6


def _sublane(dtype):
    """Sublane row multiple for dense packing of the given dtype."""
    return {4: 8, 2: 16, 1: 32}.get(jnp.dtype(dtype).itemsize, 8)


def _vmem_budget():
    """Chip-aware (per-tile byte budget, vmem_limit_bytes)."""
    try:
        cap = int(pltpu.get_tpu_info().vmem_capacity_bytes)
    except Exception:
        cap = 64 * 1024 * 1024  # assume the smallest per-TensorCore VMEM (v7x)
    # Leave headroom below physical VMEM for compiler-internal scratch.
    vmem_limit = min((cap * 3) // 4, 96 * 1024 * 1024)
    # Live VMEM per step ~= 2x(in + out) double-buffered (4 tiles) + ~6 tile-sized stencil
    # temporaries (+ f32 upcast for narrow dtypes) -> keep each tile around vmem_limit / 12.
    tile_budget = max(1 << 20, vmem_limit // 12)
    return tile_budget, vmem_limit


def _pick_tile_h(H, W, itemsize, sub, budget):
    """Pick the row-tile height.  Returns (tile_h, H_pad) with tile_h dividing H_pad.

    Prefers the whole plane when it fits the budget, else the largest sub-aligned divisor of H,
    else a budget-sized tile with H zero-padded up to a multiple of it (zero padding preserves
    the conv2d(padding=1) semantics; padded rows are sliced away by the wrapper).
    """
    max_rows = budget // max(1, W * itemsize)
    max_rows = max(sub, (max_rows // sub) * sub)
    if H <= max_rows:
        return H, H
    if H % sub == 0:
        best = 0
        for cand in range(sub, max_rows + 1, sub):
            if H % cand == 0:
                best = cand
        # Accept an exact divisor unless it is pathologically small versus the budget
        # (tiny tiles re-read the 2*sub halo rows too often and pile up per-step overhead).
        if best >= max(4 * sub, max_rows // 8):
            return best, H
    tile_h = max_rows
    h_pad = pl.cdiv(H, tile_h) * tile_h
    return tile_h, h_pad
    # TODO(synk): extremely wide W (a single sub-row tile over budget) would additionally need a
    # lane-tiled path with a 1-column halo; not required for realistic image widths.


def _grad_mag(x, top_row, bot_row):
    """Gradient magnitude of one (TH, W) tile.

    top_row / bot_row: (1, W) rows holding the row just above / just below the tile, already
    zeroed by the caller where the tile touches the image top / bottom.
    """
    TH, W = x.shape
    dt = x.dtype
    sub = _sublane(dt)
    if TH % sub == 0 and W % 128 == 0:
        # Aligned tiles: XLU rolls + thin (TH,1)/(1,W) border masks (no full-tile iota
        # temporaries, no concatenate copies).
        row = lax.broadcasted_iota(jnp.int32, (TH, 1), 0)
        col = lax.broadcasted_iota(jnp.int32, (1, W), 1)
        zero = jnp.zeros((), dt)
        x_dn = jnp.where(row == TH - 1, bot_row, pltpu.roll(x, shift=TH - 1, axis=0))
        x_up = jnp.where(row == 0, top_row, pltpu.roll(x, shift=1, axis=0))
        x_rt = jnp.where(col == W - 1, zero, pltpu.roll(x, shift=W - 1, axis=1))
        x_lt = jnp.where(col == 0, zero, pltpu.roll(x, shift=1, axis=1))
    else:
        # Fallback for unaligned tiles (small / odd shapes).
        zcol = jnp.zeros((TH, 1), dt)
        x_dn = jnp.concatenate([x[1:, :], bot_row], axis=0)
        x_up = jnp.concatenate([top_row, x[:-1, :]], axis=0)
        x_rt = jnp.concatenate([x[:, 1:], zcol], axis=1)
        x_lt = jnp.concatenate([zcol, x[:, :-1]], axis=1)
    v = (x_dn - x_up).astype(jnp.float32)
    h = (x_rt - x_lt).astype(jnp.float32)
    return jnp.sqrt(v * v + h * h + _EPS).astype(dt)


def _grad_plane3d_kernel(x_ref, o_ref):
    # Channel-folded whole-plane path: x_ref/o_ref are (3, H, W); halo rows are the zero padding.
    for c in range(3):  # static unroll over the three channels
        xc = x_ref[c]
        zrow = jnp.zeros((1, xc.shape[-1]), xc.dtype)
        o_ref[c] = _grad_mag(xc, zrow, zrow)


def _grad_plane2d_kernel(x_ref, o_ref):
    # Per-channel whole-plane path (nt == 1): halo rows are the zero padding itself.
    x = x_ref[...]
    zrow = jnp.zeros((1, x.shape[-1]), x.dtype)
    o_ref[...] = _grad_mag(x, zrow, zrow)


def _make_tiled_kernel(sub):
    def kernel(x_ref, top_ref, bot_ref, o_ref):
        # x_ref/o_ref: (tile_h, W).  top_ref/bot_ref: (sub, W) halo blocks of the same plane;
        # the needed rows are top_ref[sub-1] (row above the tile) and bot_ref[0] (row below).
        t = pl.program_id(2)
        nt = pl.num_programs(2)
        x = x_ref[...]
        dt = x.dtype
        top_row = top_ref[sub - 1:sub, :] * (t > 0).astype(dt)       # zero at image top
        bot_row = bot_ref[0:1, :] * (t < nt - 1).astype(dt)          # zero at image bottom
        o_ref[...] = _grad_mag(x, top_row, bot_row)
    return kernel


def get_gradient_nopadding(x, *, tile_h=None):
    """x: (N, C>=3, H, W). Returns (N, 3, H, W) gradient magnitude (matches the torch module)."""
    N, C, H, W = x.shape
    assert C >= 3, "Get_gradient_nopadding reads channels 0, 1, 2"
    dt = x.dtype
    itemsize = jnp.dtype(dt).itemsize
    sub = _sublane(dt)
    tile_budget, vmem_limit = _vmem_budget()

    # Lane-dense stores: pad narrow W up to one full 128-lane register.  Zero right-padding
    # preserves the conv2d(padding=1) semantics for every real column.
    W_eff = 128 if W < 128 else W
    # TODO(synk): W >= 128 with W % 128 != 0 keeps a small masked tail store per row; a
    # lane-tiled path with a 1-column halo would make it fully dense.

    plane_bytes = H * W_eff * itemsize  # one channel plane at the padded width

    # ---- choose the blocking -------------------------------------------------------------
    fold_channels = False
    if tile_h is None:
        if plane_bytes <= (1 << 20) and 3 * plane_bytes <= tile_budget:
            # Tiny feature maps: fold all 3 channels into one block (3x fewer grid steps,
            # 3x larger DMAs).
            fold_channels = True
            tile_rows, H_eff = H, H
        else:
            tile_rows, H_eff = _pick_tile_h(H, W_eff, itemsize, sub, tile_budget)
    else:
        # Explicit override (used by the tests to force the halo path); validate it.
        if H % tile_h == 0 and (tile_h == H or (tile_h % sub == 0 and H % sub == 0)):
            tile_rows, H_eff = tile_h, H
        else:
            tile_rows, H_eff = _pick_tile_h(H, W_eff, itemsize, sub, tile_budget)
    nt = H_eff // tile_rows

    if (not fold_channels and nt == 1 and N == 1
            and plane_bytes >= (2 << 20) and H_eff % (2 * sub) == 0):
        # v7x has 2 TensorCores: make sure the all-parallel grid has >= 2 balanced row tiles.
        tile_rows = H_eff // 2
        nt = 2

    # ---- materialize a padded working copy only when actually needed ----------------------
    pad_h = H_eff - H
    pad_w = W_eff - W
    if pad_h or pad_w:
        x_work = jnp.pad(x[:, :3], ((0, 0), (0, 0), (0, pad_h), (0, pad_w)))
    elif fold_channels and C != 3:
        x_work = x[:, :3]  # fold path only triggers for tiny planes; negligible copy
    else:
        x_work = x         # big-plane path: fed straight through, channels picked by the grid

    out_shape = jax.ShapeDtypeStruct((N, 3, H_eff, W_eff), dt)

    # Advisory cost estimate: ~2 HBM passes over the 3 used channels (+ halo re-reads),
    # ~7 flops and one sqrt per output element.
    n_elem = N * 3 * H_eff * W_eff
    halo_bytes = 0 if nt == 1 else N * 3 * nt * 2 * sub * W_eff * itemsize
    cost = pl.CostEstimate(flops=7 * n_elem, transcendentals=n_elem,
                           bytes_accessed=2 * n_elem * itemsize + halo_bytes)

    if fold_channels:
        grid = (N,)
        in_specs = [pl.BlockSpec((None, 3, H_eff, W_eff), lambda n: (n, 0, 0, 0))]
        out_specs = pl.BlockSpec((None, 3, H_eff, W_eff), lambda n: (n, 0, 0, 0))
        kernel = _grad_plane3d_kernel
        operands = (x_work,)
        semantics = ("parallel",)
    elif nt == 1:
        grid = (N, 3, 1)
        in_specs = [pl.BlockSpec((None, None, H_eff, W_eff), lambda n, c, t: (n, c, 0, 0))]
        out_specs = pl.BlockSpec((None, None, H_eff, W_eff), lambda n, c, t: (n, c, 0, 0))
        kernel = _grad_plane2d_kernel
        operands = (x_work,)
        semantics = ("parallel", "parallel", "parallel")
    else:
        k = tile_rows // sub     # halo blocks per tile
        nb = H_eff // sub        # number of sub-row blocks along H
        grid = (N, 3, nt)
        in_specs = [
            # main tile
            pl.BlockSpec((None, None, tile_rows, W_eff), lambda n, c, t: (n, c, t, 0)),
            # halo block whose last row is the row just above the tile (clamped at the top)
            pl.BlockSpec((None, None, sub, W_eff),
                         lambda n, c, t: (n, c, jnp.maximum(t * k - 1, 0), 0)),
            # halo block whose first row is the row just below the tile (clamped at the bottom)
            pl.BlockSpec((None, None, sub, W_eff),
                         lambda n, c, t: (n, c, jnp.minimum((t + 1) * k, nb - 1), 0)),
        ]
        out_specs = pl.BlockSpec((None, None, tile_rows, W_eff), lambda n, c, t: (n, c, t, 0))
        kernel = _make_tiled_kernel(sub)
        operands = (x_work, x_work, x_work)
        semantics = ("parallel", "parallel", "parallel")

    out = pl.pallas_call(
        kernel,
        out_shape=out_shape,
        grid=grid,
        in_specs=in_specs,
        out_specs=out_specs,
        compiler_params=pltpu.CompilerParams(
            dimension_semantics=semantics,
            vmem_limit_bytes=vmem_limit,
        ),
        cost_estimate=cost,
    )(*operands)

    if pad_h or pad_w:
        out = out[:, :, :H, :W]
    return out


def _reference(x):
    """Pure-JAX reference with identical semantics (zero-padded shifted differences)."""
    x3 = x[:, :3].astype(jnp.float32)
    xp = jnp.pad(x3, ((0, 0), (0, 0), (1, 1), (1, 1)))
    v = xp[:, :, 2:, 1:-1] - xp[:, :, :-2, 1:-1]
    h = xp[:, :, 1:-1, 2:] - xp[:, :, 1:-1, :-2]
    return jnp.sqrt(v * v + h * h + 1e-6).astype(x.dtype)


if __name__ == "__main__":
    key = jax.random.PRNGKey(0)
    k1, k2, k3 = jax.random.split(key, 3)

    # Case 1: NCHW with an extra (ignored) channel -> channel-folded whole-plane path,
    # with W padded 16 -> 128 for lane-dense stores.
    x = jax.random.normal(k1, (2, 4, 16, 16), dtype=jnp.float32)
    out = jax.block_until_ready(get_gradient_nopadding(x))
    ref = jax.block_until_ready(_reference(x))
    assert out.shape == (2, 3, 16, 16)
    assert jnp.allclose(out, ref, atol=1e-5, rtol=1e-5)

    # Case 2: force the row-tiled path (nt > 1) to exercise the halo fetch + zero gating.
    x2 = jax.random.normal(k2, (1, 3, 32, 16), dtype=jnp.float32)
    out2 = jax.block_until_ready(get_gradient_nopadding(x2, tile_h=8))
    ref2 = jax.block_until_ready(_reference(x2))
    assert out2.shape == (1, 3, 32, 16)
    assert jnp.allclose(out2, ref2, atol=1e-5, rtol=1e-5)

    # Case 3: sublane-unaligned H exercises the concatenate fallback inside the kernel.
    x3 = jax.random.normal(k3, (1, 3, 13, 16), dtype=jnp.float32)
    out3 = jax.block_until_ready(get_gradient_nopadding(x3))
    ref3 = jax.block_until_ready(_reference(x3))
    assert out3.shape == (1, 3, 13, 16)
    assert jnp.allclose(out3, ref3, atol=1e-5, rtol=1e-5)

    print("KERNEL_OK")
</pallas_src>

<mosaic_0001>
module attributes {stable_mosaic.version = 11 : i64} {
  func.func @_grad_plane3d_kernel(%arg0: i32, %arg1: memref<1x3x16x128xf32, #tpu.memory_space<vmem>>, %arg2: memref<1x3x16x128xf32, #tpu.memory_space<vmem>>) attributes {dimension_semantics = [#tpu.dimension_semantics<parallel>], iteration_bounds = array<i64: 2>, scalar_prefetch = 0 : i64, scratch_operands = 0 : i64, tpu.core_type = #tpu.core_type<tc>, window_params = [{transform_indices = @transform_0, window_bounds = array<i64: 1, 3, 16, 128>}, {transform_indices = @transform_1, window_bounds = array<i64: 1, 3, 16, 128>}]} {
    %c0 = arith.constant 0 : index
    %c0_0 = arith.constant 0 : index
    %c0_1 = arith.constant 0 : index
    %c0_2 = arith.constant 0 : index
    %0 = vector.load %arg1[%c0, %c0_0, %c0_1, %c0_2] : memref<1x3x16x128xf32, #tpu.memory_space<vmem>>, vector<1x1x16x128xf32>
    %1 = vector.shape_cast %0 : vector<1x1x16x128xf32> to vector<16x128xf32>
    %cst = arith.constant 0.000000e+00 : f32
    %2 = vector.broadcast %cst : f32 to vector<1x128xf32>
    %3 = tpu.iota {dimensions = array<i32: 0>} : vector<16x1xi32>
    %4 = tpu.iota {dimensions = array<i32: 1>} : vector<1x128xi32>
    %c15_i32 = arith.constant 15 : i32
    %5 = vector.broadcast %c15_i32 : i32 to vector<16x1xi32>
    %6 = arith.cmpi eq, %3, %5 : vector<16x1xi32>
    %c15_i32_3 = arith.constant 15 : i32
    %7 = tpu.dynamic_rotate %1 by %c15_i32_3 dim 0 : vector<16x128xf32>, i32 -> vector<16x128xf32>
    %8 = vector.shape_cast %6 : vector<16x1xi1> to vector<16x1xi1>
    %9 = vector.broadcast %8 : vector<16x1xi1> to vector<16x128xi1>
    %10 = vector.shape_cast %2 : vector<1x128xf32> to vector<1x128xf32>
    %11 = vector.broadcast %10 : vector<1x128xf32> to vector<16x128xf32>
    %12 = arith.select %9, %11, %7 : vector<16x128xi1>, vector<16x128xf32>
    %c0_i32 = arith.constant 0 : i32
    %13 = vector.broadcast %c0_i32 : i32 to vector<16x1xi32>
    %14 = arith.cmpi eq, %3, %13 : vector<16x1xi32>
    %c1_i32 = arith.constant 1 : i32
    %15 = tpu.dynamic_rotate %1 by %c1_i32 dim 0 : vector<16x128xf32>, i32 -> vector<16x128xf32>
    %16 = vector.shape_cast %14 : vector<16x1xi1> to vector<16x1xi1>
    %17 = vector.broadcast %16 : vector<16x1xi1> to vector<16x128xi1>
    %18 = vector.shape_cast %2 : vector<1x128xf32> to vector<1x128xf32>
    %19 = vector.broadcast %18 : vector<1x128xf32> to vector<16x128xf32>
    %20 = arith.select %17, %19, %15 : vector<16x128xi1>, vector<16x128xf32>
    %c127_i32 = arith.constant 127 : i32
    %21 = vector.broadcast %c127_i32 : i32 to vector<1x128xi32>
    %22 = arith.cmpi eq, %4, %21 : vector<1x128xi32>
    %c127_i32_4 = arith.constant 127 : i32
    %23 = tpu.dynamic_rotate %1 by %c127_i32_4 dim 1 : vector<16x128xf32>, i32 -> vector<16x128xf32>
    %cst_5 = arith.constant 0.000000e+00 : f32
    %24 = vector.shape_cast %22 : vector<1x128xi1> to vector<1x128xi1>
    %25 = vector.broadcast %24 : vector<1x128xi1> to vector<16x128xi1>
    %26 = vector.broadcast %cst_5 : f32 to vector<16x128xf32>
    %27 = arith.select %25, %26, %23 : vector<16x128xi1>, vector<16x128xf32>
    %c0_i32_6 = arith.constant 0 : i32
    %28 = vector.broadcast %c0_i32_6 : i32 to vector<1x128xi32>
    %29 = arith.cmpi eq, %4, %28 : vector<1x128xi32>
    %c1_i32_7 = arith.constant 1 : i32
    %30 = tpu.dynamic_rotate %1 by %c1_i32_7 dim 1 : vector<16x128xf32>, i32 -> vector<16x128xf32>
    %cst_8 = arith.constant 0.000000e+00 : f32
    %31 = vector.shape_cast %29 : vector<1x128xi1> to vector<1x128xi1>
    %32 = vector.broadcast %31 : vector<1x128xi1> to vector<16x128xi1>
    %33 = vector.broadcast %cst_8 : f32 to vector<16x128xf32>
    %34 = arith.select %32, %33, %30 : vector<16x128xi1>, vector<16x128xf32>
    %35 = arith.subf %12, %20 : vector<16x128xf32>
    %36 = arith.subf %27, %34 : vector<16x128xf32>
    %37 = arith.mulf %35, %35 : vector<16x128xf32>
    %38 = arith.mulf %36, %36 : vector<16x128xf32>
    %39 = arith.addf %37, %38 : vector<16x128xf32>
    %cst_9 = arith.constant 9.99999997E-7 : f32
    %40 = vector.broadcast %cst_9 : f32 to vector<16x128xf32>
    %41 = arith.addf %39, %40 : vector<16x128xf32>
    %42 = math.sqrt %41 : vector<16x128xf32>
    %c0_10 = arith.constant 0 : index
    %c0_11 = arith.constant 0 : index
    %c0_12 = arith.constant 0 : index
    %c0_13 = arith.constant 0 : index
    %43 = vector.load %arg2[%c0_10, %c0_11, %c0_12, %c0_13] : memref<1x3x16x128xf32, #tpu.memory_space<vmem>>, vector<1x1x16x128xf32>
    %44 = vector.shape_cast %43 : vector<1x1x16x128xf32> to vector<16x128xf32>
    %45 = vector.shape_cast %42 : vector<16x128xf32> to vector<1x1x16x128xf32>
    tpu.vector_store %arg2[%c0_10, %c0_11, %c0_12, %c0_13], %45 {strides = array<i32>} : memref<1x3x16x128xf32, #tpu.memory_space<vmem>>, vector<1x1x16x128xf32>,
    %c0_14 = arith.constant 0 : index
    %c1 = arith.constant 1 : index
    %c0_15 = arith.constant 0 : index
    %c0_16 = arith.constant 0 : index
    %46 = vector.load %arg1[%c0_14, %c1, %c0_15, %c0_16] : memref<1x3x16x128xf32, #tpu.memory_space<vmem>>, vector<1x1x16x128xf32>
    %47 = vector.shape_cast %46 : vector<1x1x16x128xf32> to vector<16x128xf32>
    %cst_17 = arith.constant 0.000000e+00 : f32
    %48 = vector.broadcast %cst_17 : f32 to vector<1x128xf32>
    %49 = tpu.iota {dimensions = array<i32: 0>} : vector<16x1xi32>
    %50 = tpu.iota {dimensions = array<i32: 1>} : vector<1x128xi32>
    %c15_i32_18 = arith.constant 15 : i32
    %51 = vector.broadcast %c15_i32_18 : i32 to vector<16x1xi32>
    %52 = arith.cmpi eq, %49, %51 : vector<16x1xi32>
    %c15_i32_19 = arith.constant 15 : i32
    %53 = tpu.dynamic_rotate %47 by %c15_i32_19 dim 0 : vector<16x128xf32>, i32 -> vector<16x128xf32>
    %54 = vector.shape_cast %52 : vector<16x1xi1> to vector<16x1xi1>
    %55 = vector.broadcast %54 : vector<16x1xi1> to vector<16x128xi1>
    %56 = vector.shape_cast %48 : vector<1x128xf32> to vector<1x128xf32>
    %57 = vector.broadcast %56 : vector<1x128xf32> to vector<16x128xf32>
    %58 = arith.select %55, %57, %53 : vector<16x128xi1>, vector<16x128xf32>
    %c0_i32_20 = arith.constant 0 : i32
    %59 = vector.broadcast %c0_i32_20 : i32 to vector<16x1xi32>
    %60 = arith.cmpi eq, %49, %59 : vector<16x1xi32>
    %c1_i32_21 = arith.constant 1 : i32
    %61 = tpu.dynamic_rotate %47 by %c1_i32_21 dim 0 : vector<16x128xf32>, i32 -> vector<16x128xf32>
    %62 = vector.shape_cast %60 : vector<16x1xi1> to vector<16x1xi1>
    %63 = vector.broadcast %62 : vector<16x1xi1> to vector<16x128xi1>
    %64 = vector.shape_cast %48 : vector<1x128xf32> to vector<1x128xf32>
    %65 = vector.broadcast %64 : vector<1x128xf32> to vector<16x128xf32>
    %66 = arith.select %63, %65, %61 : vector<16x128xi1>, vector<16x128xf32>
    %c127_i32_22 = arith.constant 127 : i32
    %67 = vector.broadcast %c127_i32_22 : i32 to vector<1x128xi32>
    %68 = arith.cmpi eq, %50, %67 : vector<1x128xi32>
    %c127_i32_23 = arith.constant 127 : i32
    %69 = tpu.dynamic_rotate %47 by %c127_i32_23 dim 1 : vector<16x128xf32>, i32 -> vector<16x128xf32>
    %cst_24 = arith.constant 0.000000e+00 : f32
    %70 = vector.shape_cast %68 : vector<1x128xi1> to vector<1x128xi1>
    %71 = vector.broadcast %70 : vector<1x128xi1> to vector<16x128xi1>
    %72 = vector.broadcast %cst_24 : f32 to vector<16x128xf32>
    %73 = arith.select %71, %72, %69 : vector<16x128xi1>, vector<16x128xf32>
    %c0_i32_25 = arith.constant 0 : i32
    %74 = vector.broadcast %c0_i32_25 : i32 to vector<1x128xi32>
    %75 = arith.cmpi eq, %50, %74 : vector<1x128xi32>
    %c1_i32_26 = arith.constant 1 : i32
    %76 = tpu.dynamic_rotate %47 by %c1_i32_26 dim 1 : vector<16x128xf32>, i32 -> vector<16x128xf32>
    %cst_27 = arith.constant 0.000000e+00 : f32
    %77 = vector.shape_cast %75 : vector<1x128xi1> to vector<1x128xi1>
    %78 = vector.broadcast %77 : vector<1x128xi1> to vector<16x128xi1>
    %79 = vector.broadcast %cst_27 : f32 to vector<16x128xf32>
    %80 = arith.select %78, %79, %76 : vector<16x128xi1>, vector<16x128xf32>
    %81 = arith.subf %58, %66 : vector<16x128xf32>
    %82 = arith.subf %73, %80 : vector<16x128xf32>
    %83 = arith.mulf %81, %81 : vector<16x128xf32>
    %84 = arith.mulf %82, %82 : vector<16x128xf32>
    %85 = arith.addf %83, %84 : vector<16x128xf32>
    %cst_28 = arith.constant 9.99999997E-7 : f32
    %86 = vector.broadcast %cst_28 : f32 to vector<16x128xf32>
    %87 = arith.addf %85, %86 : vector<16x128xf32>
    %88 = math.sqrt %87 : vector<16x128xf32>
    %c0_29 = arith.constant 0 : index
    %c1_30 = arith.constant 1 : index
    %c0_31 = arith.constant 0 : index
    %c0_32 = arith.constant 0 : index
    %89 = vector.load %arg2[%c0_29, %c1_30, %c0_31, %c0_32] : memref<1x3x16x128xf32, #tpu.memory_space<vmem>>, vector<1x1x16x128xf32>
    %90 = vector.shape_cast %89 : vector<1x1x16x128xf32> to vector<16x128xf32>
    %91 = vector.shape_cast %88 : vector<16x128xf32> to vector<1x1x16x128xf32>
    tpu.vector_store %arg2[%c0_29, %c1_30, %c0_31, %c0_32], %91 {strides = array<i32>} : memref<1x3x16x128xf32, #tpu.memory_space<vmem>>, vector<1x1x16x128xf32>,
    %c0_33 = arith.constant 0 : index
    %c2 = arith.constant 2 : index
    %c0_34 = arith.constant 0 : index
    %c0_35 = arith.constant 0 : index
    %92 = vector.load %arg1[%c0_33, %c2, %c0_34, %c0_35] : memref<1x3x16x128xf32, #tpu.memory_space<vmem>>, vector<1x1x16x128xf32>
    %93 = vector.shape_cast %92 : vector<1x1x16x128xf32> to vector<16x128xf32>
    %cst_36 = arith.constant 0.000000e+00 : f32
    %94 = vector.broadcast %cst_36 : f32 to vector<1x128xf32>
    %95 = tpu.iota {dimensions = array<i32: 0>} : vector<16x1xi32>
    %96 = tpu.iota {dimensions = array<i32: 1>} : vector<1x128xi32>
    %c15_i32_37 = arith.constant 15 : i32
    %97 = vector.broadcast %c15_i32_37 : i32 to vector<16x1xi32>
    %98 = arith.cmpi eq, %95, %97 : vector<16x1xi32>
    %c15_i32_38 = arith.constant 15 : i32
    %99 = tpu.dynamic_rotate %93 by %c15_i32_38 dim 0 : vector<16x128xf32>, i32 -> vector<16x128xf32>
    %100 = vector.shape_cast %98 : vector<16x1xi1> to vector<16x1xi1>
    %101 = vector.broadcast %100 : vector<16x1xi1> to vector<16x128xi1>
    %102 = vector.shape_cast %94 : vector<1x128xf32> to vector<1x128xf32>
    %103 = vector.broadcast %102 : vector<1x128xf32> to vector<16x128xf32>
    %104 = arith.select %101, %103, %99 : vector<16x128xi1>, vector<16x128xf32>
    %c0_i32_39 = arith.constant 0 : i32
    %105 = vector.broadcast %c0_i32_39 : i32 to vector<16x1xi32>
    %106 = arith.cmpi eq, %95, %105 : vector<16x1xi32>
    %c1_i32_40 = arith.constant 1 : i32
    %107 = tpu.dynamic_rotate %93 by %c1_i32_40 dim 0 : vector<16x128xf32>, i32 -> vector<16x128xf32>
    %108 = vector.shape_cast %106 : vector<16x1xi1> to vector<16x1xi1>
    %109 = vector.broadcast %108 : vector<16x1xi1> to vector<16x128xi1>
    %110 = vector.shape_cast %94 : vector<1x128xf32> to vector<1x128xf32>
    %111 = vector.broadcast %110 : vector<1x128xf32> to vector<16x128xf32>
    %112 = arith.select %109, %111, %107 : vector<16x128xi1>, vector<16x128xf32>
    %c127_i32_41 = arith.constant 127 : i32
    %113 = vector.broadcast %c127_i32_41 : i32 to vector<1x128xi32>
    %114 = arith.cmpi eq, %96, %113 : vector<1x128xi32>
    %c127_i32_42 = arith.constant 127 : i32
    %115 = tpu.dynamic_rotate %93 by %c127_i32_42 dim 1 : vector<16x128xf32>, i32 -> vector<16x128xf32>
    %cst_43 = arith.constant 0.000000e+00 : f32
    %116 = vector.shape_cast %114 : vector<1x128xi1> to vector<1x128xi1>
    %117 = vector.broadcast %116 : vector<1x128xi1> to vector<16x128xi1>
    %118 = vector.broadcast %cst_43 : f32 to vector<16x128xf32>
    %119 = arith.select %117, %118, %115 : vector<16x128xi1>, vector<16x128xf32>
    %c0_i32_44 = arith.constant 0 : i32
    %120 = vector.broadcast %c0_i32_44 : i32 to vector<1x128xi32>
    %121 = arith.cmpi eq, %96, %120 : vector<1x128xi32>
    %c1_i32_45 = arith.constant 1 : i32
    %122 = tpu.dynamic_rotate %93 by %c1_i32_45 dim 1 : vector<16x128xf32>, i32 -> vector<16x128xf32>
    %cst_46 = arith.constant 0.000000e+00 : f32
    %123 = vector.shape_cast %121 : vector<1x128xi1> to vector<1x128xi1>
    %124 = vector.broadcast %123 : vector<1x128xi1> to vector<16x128xi1>
    %125 = vector.broadcast %cst_46 : f32 to vector<16x128xf32>
    %126 = arith.select %124, %125, %122 : vector<16x128xi1>, vector<16x128xf32>
    %127 = arith.subf %104, %112 : vector<16x128xf32>
    %128 = arith.subf %119, %126 : vector<16x128xf32>
    %129 = arith.mulf %127, %127 : vector<16x128xf32>
    %130 = arith.mulf %128, %128 : vector<16x128xf32>
    %131 = arith.addf %129, %130 : vector<16x128xf32>
    %cst_47 = arith.constant 9.99999997E-7 : f32
    %132 = vector.broadcast %cst_47 : f32 to vector<16x128xf32>
    %133 = arith.addf %131, %132 : vector<16x128xf32>
    %134 = math.sqrt %133 : vector<16x128xf32>
    %c0_48 = arith.constant 0 : index
    %c2_49 = arith.constant 2 : index
    %c0_50 = arith.constant 0 : index
    %c0_51 = arith.constant 0 : index
    %135 = vector.load %arg2[%c0_48, %c2_49, %c0_50, %c0_51] : memref<1x3x16x128xf32, #tpu.memory_space<vmem>>, vector<1x1x16x128xf32>
    %136 = vector.shape_cast %135 : vector<1x1x16x128xf32> to vector<16x128xf32>
    %137 = vector.shape_cast %134 : vector<16x128xf32> to vector<1x1x16x128xf32>
    tpu.vector_store %arg2[%c0_48, %c2_49, %c0_50, %c0_51], %137 {strides = array<i32>} : memref<1x3x16x128xf32, #tpu.memory_space<vmem>>, vector<1x1x16x128xf32>,
    return
  }
  func.func @transform_0(%arg0: i32) -> (i32, i32, i32, i32) {
    %c0_i32 = arith.constant 0 : i32
    %c0_i32_0 = arith.constant 0 : i32
    %c0_i32_1 = arith.constant 0 : i32
    %c0_i32_2 = arith.constant 0 : i32
    return %arg0, %c0_i32, %c0_i32_0, %c0_i32_1 : i32, i32, i32, i32
  }
  func.func @transform_1(%arg0: i32) -> (i32, i32, i32, i32) {
    %c0_i32 = arith.constant 0 : i32
    %c0_i32_0 = arith.constant 0 : i32
    %c0_i32_1 = arith.constant 0 : i32
    %c0_i32_2 = arith.constant 0 : i32
    return %arg0, %c0_i32, %c0_i32_0, %c0_i32_1 : i32, i32, i32, i32
  }
}

</mosaic_0001>

<bundles_post_ra>
// kernel: tpu_custom_call.1
= control target key start
LH: loop header
LB: loop body
LE: loop exit
PB: predicated region body
PF: predicated region fallthrough
CT: control target
= control target key end

     0   :  { %6 = vsyncpa [#allocation3], 0  ;;  %s861_s0 = inlined_call_operand.hbm [shape: f32[2,3,16,128], index: 0, kind: input, shape index: {}]   ;;  %s862_s1 = inlined_call_operand.hbm [shape: f32[2,3,16,128], index: 1, kind: output, shape index: {}]  }
   0x1   :  { %8 = vsyncpa [#allocation3 + $0x1], 0 }
   0x2   :  { %9 = vsyncpa [#allocation4], 0 }
   0x3   :  { %11 = vsyncpa [#allocation4 + $0x1], 0  ;;  %s645_s6 = smov 0   ;;  %s647_s7 = smov 0  }
   0x4   :  { %s649_s8 = smov 0   ;;  %s651_s9 = smov 0  }
   0x5 LB: > { %s666_s10 = sadd.s32 4294967295, %s627_s9   ;;  %s447_s11 = sadd.s32 4294967294, %s627_s9   ;;  %s627_s9 = sphi %s651_s9, %s870_s9   ;;  %s623_s8 = sphi %s649_s8, %s869_s8   ;;  %s619_s7 = sphi %s647_s7, %s868_s7   ;;  %s615_s6 = sphi %s645_s6, %s867_s6  }
   0x6   : > { %s670_s12 = sadd.s32 1, %s627_s9   ;;  %s24_s13 = sadd.s32 1, %s623_s8 }
   0x7   : > { %s21_s14 = ssub.s32 %s627_s9, %s670_s12  ;;  %p31_p0 = scmp.ne.s32.totalorder %s623_s8, %s619_s7 }
   0x8   : > { %p22_p1 = scmp.eq.s32.totalorder %s21_s14, 0  ;;  %p32_p2 = scmp.eq.s32.totalorder %s627_s9, 0 }
   0x9   : > { %p37_p3 = scmp.ne.s32.totalorder %s619_s7, %s615_s6  ;;  %p38_p4 = scmp.eq.s32.totalorder %s666_s10, 0 }
   0xa   : > { %s682_s15 = scalar_select %p22_p1, %s623_s8, %s24_s13  }
   0xb   : > { %p33_p5 = por %p32_p2, %p31_p0  ;;  %p684_p6 = por %p38_p4, %p37_p3 }
   0xc   : > { %p61_p7 = scmp.eq.s32.totalorder %s666_s10, 1  ;;  %p67_p8 = scmp.eq.s32.totalorder %s447_s11, 1 }
   0xd   : > { %p449_p9 = scmp.ge.s32.totalorder %s627_s9, 2  ;;  %p479_p10 = scmp.lt.s32.totalorder %s627_s9, 2 }
   0xe   : > { %p691_p11 = por %p61_p7, %p31_p0  ;;  %p695_p12 = por %p67_p8, %p37_p3 }
   0xf   : > { %s87_s19 = sand.u32 1, %s623_s8   ;;  %s464_s20 = smul.u32 48, %s627_s9 }
  0x10   : > { %s463_s21 = smul.u32 48, %s87_s19  ;;  %p704_p13 = pnand %p479_p10, %p33_p5 }
  0x11   : > { %s96_s24 = scalar_lea.hbm %s861_s0, %s464_s20  ;;  %s88_s29 = scalar_lea.sflag [#allocation3], %s87_s19 }
  0x12   : > { %s97_s26 = sshll.u32 %s96_s24, 4  ;;  %s91_s27 = scalar_lea.vmem [#allocation2], %s463_s21  ;;  %s98_s26 = int_to_ptr.hbm [resolvable:$true] %s97_s26 }
  0x13   : > { %s99_s28 = sshll.u32 %s91_s27, 4  ;;  %s531_s30 = sshra.s32 %s98_s26, 4  ;;  %s100_s28 = int_to_ptr.vmem [resolvable:$true] %s99_s28  ;;  %s532_s30 = int_to_ptr.hbm [resolvable:$true] %s531_s30 }
  0x14   : > { %s533_s2 = scalar_lea.hbm %s532_s30, 48  ;;  %p535_p1 = pneg %p704_p13 }
  0x15   : > { %p534_p0 = scmp.ne.s32.totalorder %s532_s30, %s533_s2  ;;  %s538_s5 = scalar_lea.hbm %s861_s0, 96 }
  0x16   : > { %p539_p4 = scmp.lt.s32.totalorder %s532_s30, %s861_s0  ;;  %p540_p5 = scmp.lt.s32.totalorder %s538_s5, %s533_s2 }
  0x17   : > { %p536_p2 = pnand %p535_p1, %p534_p0 }
  0x18   : > { %p541_p7 = por %p540_p5, %p539_p4 }
  0x19   : > { %p537_p3 = pneg %p536_p2 }
  0x1b   : > { %p542_p8 = pnand %p541_p7, %p537_p3 }
  0x1d   : > { %545 = shalt.err (!%p542_p8)
}
  0x1e   : > { %s629_s14 = smov 128   ;;  %s630_s19 = smov 8  }
  0x1f   : > { %474 = dma.hbm_to_vmem [thread:$0]  (!%p704_p13), %s98_s26, 768, %s100_s28, %s88_s29, %s629_s14, %s629_s14, %s630_s19  }
  0x20   : > { %p451_p10 = scmp.ge.s32.totalorder %s627_s9, 1  ;;  %p107_p0 = scmp.lt.s32.totalorder %s627_s9, 3 }
  0x22   : > { %p108_p1 = pnand %p451_p10, %p107_p0 }
  0x23   : > { %s721_s20 = sand.u32 (!%p108_p1), 1, %s619_s7  }
  0x24   : > { %111 = sbr.rel (%p108_p1) target bundleno = 217 (0xd9), region = 24  ;;  %s114_s22 = scalar_lea.sflag (!%p108_p1), [#allocation3], %s721_s20 }
  0x25   : > { %s465_s21 = smul.u32 (!%p108_p1), 48, %s721_s20 }
  0x27   : > { %s117_s23 = scalar_lea.vmem (!%p108_p1), [#allocation2], %s465_s21 }
  0x29   : > { %606 = dma.done.wait (%p684_p6), %s114_s22, 768  }
  0x2a   : > { %608 = vsyncadd (%p684_p6), %s114_s22, 4294966528  ;;  %v137_v0 = vld [vmem:[%s117_s23] sm:$0xff]  ;;  %s631_s24 = smov 1   ;;  %s632_s25 = smov 127   ;;  %v452_v1 = vld [vmem:[%s117_s23 + $0x10] sm:$0xff]  ;;  %v139_v6 = vlaneseq }
  0x2b   : > { %180 = vrot.lane.b32.xlu1 %v137_v0, %s631_s24  ;;  %171 = vrot.lane.b32.xlu0 %v137_v0, %s632_s25  ;;  %v138_v2 = vld [vmem:[%s117_s23 + $0x8] sm:$0xff]  ;;  %v453_v3 = vld [vmem:[%s117_s23 + $0x18] sm:$0xff]  ;;  %v159_v8 = vrot.slane %v137_v0, 7  ;;  %v146_v10 = vrot.slane %v137_v0, 1  ;;  %v229_v23 = vrot.slane %v452_v1, 1  ;;  %v235_v24 = vrot.slane %v452_v1, 7 }
  0x2c   : > { %241 = vrot.lane.b32.xlu2 %v452_v1, %s632_s25  ;;  %v456_v4 = vld [vmem:[%s117_s23 + $0x20] sm:$0xff]  ;;  %v457_v5 = vld [vmem:[%s117_s23 + $0x28] sm:$0xff]  ;;  %v140_v7 = vshrl.u32 %v139_v6, 7  ;;  %v160_v9 = vrot.slane %v138_v2, 7  ;;  %v147_v11 = vrot.slane %v138_v2, 1  ;;  %v230_v21 = vrot.slane %v453_v3, 1 }
  0x2d   : > { %v236_v22 = vrot.slane %v453_v3, 7  ;;  %v301_v33 = vrot.slane %v456_v4, 7  ;;  %v302_v34 = vrot.slane %v457_v5, 7  ;;  %v295_v35 = vrot.slane %v456_v4, 1  ;;  %s793_s16 = scalar_lea.vmem [#allocation5], %s465_s21  ;;  %s466_s26 = smul.u32 48, %s666_s10 }
  0x2e   : > { %vm161_vm0 = vcmp.lt.s32.totalorder %v140_v7, 1  ;;  %vm148_vm1 = vcmp.lt.s32.totalorder %v140_v7, 7  ;;  %vm157_vm2 = vcmp.eq.s32.totalorder %v140_v7, 0  ;;  %v141_v16 = vadd.s32 8, %v140_v7  ;;  %s371_s10 = sshll.u32 %s793_s16, 4  ;;  %s359_s2 = scalar_lea.sflag [#allocation4], %s721_s20  ;;  %s372_s10 = int_to_ptr.vmem [resolvable:$true] %s371_s10 }
  0x2f   : > { %v163_v12 = vsel %vm161_vm0, %v160_v9, %v159_v8  ;;  %v149_v13 = vsel %vm148_vm1, %v146_v10, %v147_v11  ;;  %v150_v17 = vsel %vm148_vm1, %v147_v11, %v146_v10  ;;  %v162_v19 = vsel %vm161_vm0, %v159_v8, %v160_v9  ;;  %s370_s29 = scalar_lea.hbm %s862_s1, %s466_s26  ;;  %s581_s13 = scalar_lea.hbm %s862_s1, 96 }
  0x30   : > { %v168_v14 = vsel %vm157_vm2, 0.0, %v163_v12  ;;  %vm145_vm3 = vcmp.eq.s32.totalorder %v141_v16, 15  ;;  %v232_v25 = vsel %vm148_vm1, %v230_v21, %v229_v23  ;;  %v238_v26 = vsel %vm161_vm0, %v236_v22, %v235_v24  ;;  %s373_s30 = sshll.u32 %s370_s29, 4  ;;  %s374_s30 = int_to_ptr.hbm [resolvable:$true] %s373_s30 }
  0x31   : > { %v188_v15 = vsub.f32 %v149_v13, %v168_v14  ;;  %v156_v18 = vsel %vm145_vm3, 0.0, %v150_v17  ;;  %v234_v27 = vsel %vm145_vm3, 0.0, %v232_v25  ;;  %v237_v28 = vsel %vm161_vm0, %v235_v24, %v236_v22  ;;  %s575_s3 = sshra.s32 %s374_s30, 4  ;;  %s576_s3 = int_to_ptr.hbm [resolvable:$true] %s575_s3 }
  0x32   : > { %v189_v20 = vsub.f32 %v156_v18, %v162_v19  ;;  %v231_v29 = vsel %vm148_vm1, %v229_v23, %v230_v21  ;;  %v239_v30 = vsel %vm157_vm2, 0.0, %v238_v26  ;;  %v254_v31 = vsub.f32 %v234_v27, %v237_v28  ;;  %s577_s4 = scalar_lea.hbm %s576_s3, 48  ;;  %p582_p3 = scmp.lt.s32.totalorder %s576_s3, %s862_s1 }
  0x33   : > { %182 = vrot.lane.b32.xlu1 %v138_v2, %s631_s24  ;;  %173 = vrot.lane.b32.xlu0 %v138_v2, %s632_s25  ;;  %v253_v32 = vsub.f32 %v231_v29, %v239_v30  ;;  %v296_v36 = vrot.slane %v457_v5, 1  ;;  %v743_v38 = vand.u32 127, %v139_v6  ;;  %v304_v39 = vsel %vm161_vm0, %v302_v34, %v301_v33  ;;  %p578_p6 = scmp.ne.s32.totalorder %s576_s3, %s577_s4  ;;  %p583_p4 = scmp.lt.s32.totalorder %s581_s13, %s577_s4 }
  0x34   : > { %243 = vrot.lane.b32.xlu2 %v453_v3, %s632_s25  ;;  %v305_v41 = vsel %vm157_vm2, 0.0, %v304_v39  ;;  %v303_v45 = vsel %vm161_vm0, %v301_v33, %v302_v34  ;;  %v192_v52 = vmul.f32 %v188_v15, %v188_v15  ;;  %v193_v62 = vmul.f32 %v189_v20, %v189_v20 }
  0x35   : > { %v297_v40 = vsel %vm148_vm1, %v295_v35, %v296_v36  ;;  %v298_v42 = vsel %vm148_vm1, %v296_v36, %v295_v35  ;;  %vm170_vm4 = vcmp.eq.s32.totalorder %v743_v38, 127  ;;  %vm179_vm5 = vcmp.eq.s32.totalorder %v743_v38, 0  ;;  %p579_p13 = pnand %p578_p6, %p691_p11  ;;  %p584_p5 = por %p583_p4, %p582_p3 }
  0x36   : > { %v319_v43 = vsub.f32 %v297_v40, %v305_v41  ;;  %v300_v44 = vsel %vm145_vm3, 0.0, %v298_v42  ;;  %v258_v11 = vmul.f32 %v254_v31, %v254_v31  ;;  %v257_v13 = vmul.f32 %v253_v32, %v253_v32 }
  0x37   : > { %v751_v46 = vsub.f32 %v300_v44, %v303_v45  ;;  %p580_p2 = pneg %p579_p13 }
  0x38   : > { %v323_v35 = vmul.f32 %v319_v43, %v319_v43 }
  0x39   : > { %v324_v41 = vmul.f32 %v751_v46, %v751_v46  ;;  %p585_p7 = pnand %p584_p5, %p580_p2 }
  0x3b   : > { %249 = vrot.lane.b32.xlu1 %v453_v3, %s631_s24  ;;  %247 = vrot.lane.b32.xlu0 %v452_v1, %s631_s24 }
  0x3c   : > { %307 = vrot.lane.b32.xlu2 %v456_v4, %s632_s25 }
  0x43   : > { %313 = vrot.lane.b32.xlu1 %v456_v4, %s631_s24  ;;  %309 = vrot.lane.b32.xlu0 %v457_v5, %s632_s25 }
  0x44   : > { %315 = vrot.lane.b32.xlu2 %v457_v5, %s631_s24 }
  0x86   : > { %v242_v37 = vpop.permute.xlu2 %241 }
  0x87   : > { %v245_v3 = vsel %vm170_vm4, 0.0, %v242_v37 }
  0x8e   : > { %v244_v53 = vpop.permute.xlu2 %243 }
  0x8f   : > { %v246_v4 = vsel %vm170_vm4, 0.0, %v244_v53 }
  0x96   : > { %v308_v0 = vpop.permute.xlu2 %307 }
  0x97   : > { %v311_v34 = vsel %vm170_vm4, 0.0, %v308_v0 }
  0x9d   : > { %v181_v47 = vpop.permute.xlu1 %180  ;;  %v172_v48 = vpop.permute.xlu0 %171 }
  0x9e   : > { %v186_v49 = vsel %vm179_vm5, 0.0, %v181_v47  ;;  %v177_v50 = vsel %vm170_vm4, 0.0, %v172_v48  ;;  %v316_v22 = vpop.permute.xlu2 %315 }
  0x9f   : > { %v190_v51 = vsub.f32 %v177_v50, %v186_v49  ;;  %v318_v31 = vsel %vm179_vm5, 0.0, %v316_v22 }
  0xa1   : > { %v194_v54 = vmul.f32 %v190_v51, %v190_v51 }
  0xa3   : > { %v196_v55 = vadd.f32 %v194_v54, %v192_v52 }
  0xa5   : > { %v198_v56 = vadd.f32 1e-06, %v196_v55  ;;  %v183_v57 = vpop.permute.xlu1 %182  ;;  %v174_v58 = vpop.permute.xlu0 %173 }
  0xa6   : > { %v187_v59 = vsel %vm179_vm5, 0.0, %v183_v57  ;;  %v178_v60 = vsel %vm170_vm4, 0.0, %v174_v58 }
  0xa7   : > { %519 = vrsqrt.f32 %v198_v56  ;;  %v191_v61 = vsub.f32 %v178_v60, %v187_v59  ;;  %vm207_vm6 = vcmp.eq.f32.partialorder %v198_v56, inf  ;;  %v210_v36 = vand.u32 2147483648, %v198_v56 }
  0xa8   : > { %vm209_vm7 = vcmp.eq.f32.partialorder %v198_v56, 0.0 }
  0xa9   : > { %v195_v63 = vmul.f32 %v191_v61, %v191_v61 }
  0xab   : > { %v197_v1 = vadd.f32 %v195_v63, %v193_v62 }
  0xad   : > { %v520_v2 = vpop.eup %519  ;;  %v250_v5 = vpop.permute.xlu1 %249  ;;  %v767_v8 = vadd.f32 1e-06, %v197_v1 }
  0xae   : > { %v248_v6 = vpop.permute.xlu0 %247  ;;  %v201_v7 = vmul.f32 %v520_v2, %v198_v56  ;;  %v252_v9 = vsel %vm179_vm5, 0.0, %v250_v5 }
  0xaf   : > { %v251_v10 = vsel %vm179_vm5, 0.0, %v248_v6  ;;  %v256_v12 = vsub.f32 %v246_v4, %v252_v9  ;;  %521 = vrsqrt.f32 %v767_v8  ;;  %vm219_vm8 = vcmp.eq.f32.partialorder %v767_v8, inf }
  0xb0   : > { %v255_v14 = vsub.f32 %v245_v3, %v251_v10  ;;  %v202_v15 = vmul.f32 %v520_v2, %v201_v7  ;;  %v222_v59 = vand.u32 2147483648, %v767_v8  ;;  %vm221_vm9 = vcmp.eq.f32.partialorder %v767_v8, 0.0 }
  0xb1   : > { %v260_v16 = vmul.f32 %v256_v12, %v256_v12 }
  0xb2   : > { %v259_v17 = vmul.f32 %v255_v14, %v255_v14  ;;  %v203_v18 = vmul.f32 0.5, %v202_v15 }
  0xb3   : > { %v262_v19 = vadd.f32 %v260_v16, %v258_v11 }
  0xb4   : > { %v261_v20 = vadd.f32 %v259_v17, %v257_v13  ;;  %v204_v21 = vsub.f32 1.5, %v203_v18 }
  0xb5   : > { %v774_v23 = vadd.f32 1e-06, %v262_v19  ;;  %v314_v25 = vpop.permute.xlu1 %313  ;;  %v522_v27 = vpop.eup %521 }
  0xb6   : > { %v776_v24 = vadd.f32 1e-06, %v261_v20  ;;  %v310_v26 = vpop.permute.xlu0 %309  ;;  %v205_v28 = vmul.f32 %v520_v2, %v204_v21  ;;  %v317_v29 = vsel %vm179_vm5, 0.0, %v314_v25  ;;  %v213_v30 = vmul.f32 %v522_v27, %v767_v8 }
  0xb7   : > { %523 = vrsqrt.f32 %v774_v23  ;;  %v312_v32 = vsel %vm170_vm4, 0.0, %v310_v26  ;;  %v321_v39 = vsub.f32 %v311_v34, %v317_v29  ;;  %vm284_vm10 = vcmp.eq.f32.partialorder %v774_v23, inf }
  0xb8   : > { %v206_v33 = vmul.f32 %v205_v28, %v198_v56  ;;  %525 = vrsqrt.f32 %v776_v24  ;;  %v214_v37 = vmul.f32 %v522_v27, %v213_v30  ;;  %v322_v42 = vsub.f32 %v312_v32, %v318_v31 }
  0xb9   : > { %v325_v47 = vmul.f32 %v321_v39, %v321_v39  ;;  %vm286_vm11 = vcmp.eq.f32.partialorder %v774_v23, 0.0  ;;  %vm272_vm12 = vcmp.eq.f32.partialorder %v776_v24, inf  ;;  %v275_v12 = vand.u32 2147483648, %v776_v24 }
  0xba   : > { %v208_v40 = vsel %vm207_vm6, %v198_v56, %v206_v33  ;;  %v215_v45 = vmul.f32 0.5, %v214_v37  ;;  %v326_v38 = vmul.f32 %v322_v42, %v322_v42  ;;  %vm274_vm13 = vcmp.eq.f32.partialorder %v776_v24, 0.0 }
  0xbb   : > { %v211_v44 = vsel %vm209_vm7, %v210_v36, %v208_v40  ;;  %v327_v49 = vadd.f32 %v325_v47, %v323_v35 }
  0xbc   : > { %224 = vst [vmem:[%s793_s16] sm:$0xff] %v211_v44  ;;  %v216_v48 = vsub.f32 1.5, %v215_v45  ;;  %v328_v52 = vadd.f32 %v326_v38, %v324_v41 }
  0xbd   : > { %v524_v43 = vpop.eup %523  ;;  %v329_v54 = vadd.f32 1e-06, %v327_v49 }
  0xbe   : > { %v526_v50 = vpop.eup %525  ;;  %v278_v51 = vmul.f32 %v524_v43, %v774_v23  ;;  %v217_v53 = vmul.f32 %v522_v27, %v216_v48  ;;  %v798_v56 = vadd.f32 1e-06, %v328_v52 }
  0xbf   : > { %v266_v46 = vmul.f32 %v526_v50, %v776_v24  ;;  %527 = vrsqrt.f32 %v329_v54  ;;  %vm338_vm14 = vcmp.eq.f32.partialorder %v329_v54, inf  ;;  %vm340_vm15 = vcmp.eq.f32.partialorder %v329_v54, 0.0 }
  0xc0   : > { %v279_v55 = vmul.f32 %v524_v43, %v278_v51  ;;  %v218_v57 = vmul.f32 %v217_v53, %v767_v8  ;;  %529 = vrsqrt.f32 %v798_v56  ;;  %vm350_vm0 = vcmp.eq.f32.partialorder %v798_v56, inf }
  0xc1   : > { %v267_v58 = vmul.f32 %v526_v50, %v266_v46  ;;  %v353_v28 = vand.u32 2147483648, %v798_v56  ;;  %vm352_vm1 = vcmp.eq.f32.partialorder %v798_v56, 0.0 }
  0xc2   : > { %v280_v60 = vmul.f32 0.5, %v279_v55  ;;  %v220_v61 = vsel %vm219_vm8, %v767_v8, %v218_v57  ;;  %v287_v8 = vand.u32 2147483648, %v774_v23 }
  0xc3   : > { %v268_v62 = vmul.f32 0.5, %v267_v58  ;;  %v223_v63 = vsel %vm221_vm9, %v222_v59, %v220_v61 }
  0xc4   : > { %v281_v0 = vsub.f32 1.5, %v280_v60  ;;  %225 = vst [vmem:[%s793_s16 + $0x8] sm:$0xff] %v223_v63 }
  0xc5   : > { %v269_v1 = vsub.f32 1.5, %v268_v62  ;;  %v528_v3 = vpop.eup %527 }
  0xc6   : > { %v282_v2 = vmul.f32 %v524_v43, %v281_v0  ;;  %v530_v5 = vpop.eup %529  ;;  %v332_v7 = vmul.f32 %v528_v3, %v329_v54 }
  0xc7   : > { %v270_v4 = vmul.f32 %v526_v50, %v269_v1  ;;  %v344_v10 = vmul.f32 %v530_v5, %v798_v56 }
  0xc8   : > { %v283_v6 = vmul.f32 %v282_v2, %v774_v23  ;;  %v333_v13 = vmul.f32 %v528_v3, %v332_v7 }
  0xc9   : > { %v271_v9 = vmul.f32 %v270_v4, %v776_v24  ;;  %v345_v16 = vmul.f32 %v530_v5, %v344_v10 }
  0xca   : > { %v285_v11 = vsel %vm284_vm10, %v774_v23, %v283_v6  ;;  %v334_v18 = vmul.f32 0.5, %v333_v13 }
  0xcb   : > { %v288_v14 = vsel %vm286_vm11, %v287_v8, %v285_v11  ;;  %v273_v15 = vsel %vm272_vm12, %v776_v24, %v271_v9  ;;  %v346_v19 = vmul.f32 0.5, %v345_v16  ;;  %v341_v24 = vand.u32 2147483648, %v329_v54 }
  0xcc   : > { %455 = vst [vmem:[%s793_s16 + $0x18] sm:$0xff] %v288_v14  ;;  %v276_v17 = vsel %vm274_vm13, %v275_v12, %v273_v15  ;;  %v335_v20 = vsub.f32 1.5, %v334_v18 }
  0xcd   : > { %454 = vst [vmem:[%s793_s16 + $0x10] sm:$0xff] %v276_v17  ;;  %v347_v21 = vsub.f32 1.5, %v346_v19 }
  0xce   : > { %v336_v22 = vmul.f32 %v528_v3, %v335_v20 }
  0xcf   : > { %v348_v23 = vmul.f32 %v530_v5, %v347_v21 }
  0xd0   : > { %v337_v25 = vmul.f32 %v336_v22, %v329_v54 }
  0xd1   : > { %v349_v26 = vmul.f32 %v348_v23, %v798_v56 }
  0xd2   : > { %v339_v27 = vsel %vm338_vm14, %v329_v54, %v337_v25 }
  0xd3   : > { %v342_v29 = vsel %vm340_vm15, %v341_v24, %v339_v27  ;;  %v351_v30 = vsel %vm350_vm0, %v798_v56, %v349_v26 }
  0xd4   : > { %458 = vst [vmem:[%s793_s16 + $0x20] sm:$0xff] %v342_v29  ;;  %v354_v31 = vsel %vm352_vm1, %v353_v28, %v351_v30 }
  0xd5   : > { %459 = vst [vmem:[%s793_s16 + $0x28] sm:$0xff] %v354_v31 }
  0xd6   : > { %588 = shalt.err (!%p585_p7)
}
  0xd7   : > { %s633_s20 = smov 128   ;;  %s634_s21 = smov 8  }
  0xd8   : > { %469 = dma.vmem_to_hbm [thread:$0]  (%p691_p11), %s372_s10, 768, %s374_s30, %s359_s2, %s633_s20, %s633_s20, %s634_s21  }
  0xd9 PF: > { %s388_s22 = sand.u32 1, %s615_s6   ;;  %p476_p8 = pnand %p449_p9, %p695_p12 }
  0xda   : > { %s389_s23 = scalar_lea.sflag [#allocation4], %s388_s22 }
  0xdb   : > { %p477_p10 = pneg %p476_p8 }
  0xdd   : > { %610 = dma.done.wait (%p477_p10), %s389_s23, 768  }
  0xde   : > { %612 = vsyncadd (%p477_p10), %s389_s23, 4294966528  ;;  %p14_p0 = scmp.ge.s32.totalorder %s670_s12, 4   ;;  %s867_s6 = smov %s619_s7 }
  0xdf   : > { %s868_s7 = smov %s623_s8  ;;  %s869_s8 = smov %s682_s15 }
  0xe0   : > { %s870_s9 = smov %s670_s12  ;;  %16 = sbr.rel (!%p14_p0) target bundleno = 5 (0x5), region = 73 }
  0xe5   :  { %395 = vsyncpa [#allocation3], 1 }
  0xe6   :  { %397 = vsyncpa [#allocation3 + $0x1], 1 }
  0xe7   :  { %398 = vsyncpa [#allocation4], 1 }
  0xe8   :  { %400 = vsyncpa [#allocation4 + $0x1], 1 }

</bundles_post_ra>
